<compile_context>
chip_gen: v6e
topology: v6e:2x2x1
jax: 0.10.0
libtpu: 0.0.40
codegen_flags: <defaults>
</compile_context>

<pallas_src>
import functools

import jax
import jax.numpy as jnp
from jax.experimental import pallas as pl
from jax.experimental.pallas import tpu as pltpu

BN_EPS = 1e-5       # nn.BatchNorm1d default
NEG_SLOPE = 0.2     # GATConv default negative_slope
MASK_VAL = -1e30


# --------------------------------------------------------------------------
# kernels
# --------------------------------------------------------------------------
def _gcn_bn_relu_kernel(adj_ref, dinv_ref, hw_ref, scale_ref, shift_ref, out_ref):
    """One row tile of ReLU(BN(D^{-1/2}(A+I)D^{-1/2} (h W) + b)).

    hw_ref   : (N, F) bf16, precomputed (h @ W) * dinv  (column scale folded)
    scale/shift : BN (and GCN bias) folded to an affine transform.
    """
    adj = adj_ref[...].astype(jnp.bfloat16)                      # (T, N) int8 {0,1} -> bf16
    agg = jnp.dot(adj, hw_ref[...], preferred_element_type=jnp.float32)   # (T, F) f32
    out_ref[...] = jnp.maximum(agg * dinv_ref[...] * scale_ref[...] + shift_ref[...], 0.0)


def _gat_kernel(adj_ref, a_dst_ref, xh_ref, a_src_ref, b_ref, out_ref, *, heads, relu):
    """One row tile of a PyG GATConv (concat=False: mean over heads) + bias.

    a_dst_ref : (T, heads) f32   per-destination attention term (this tile)
    xh_ref    : (heads, N, F) bf16, precomputed (x W_h) / heads
    a_src_ref : (heads, N) f32   per-source attention term
    """
    mask = adj_ref[...] > 0                                       # (T, N) bool, no f32 cast
    acc = jnp.zeros(out_ref.shape, jnp.float32)
    for hd in range(heads):
        e = a_dst_ref[:, hd:hd + 1] + a_src_ref[hd:hd + 1, :]     # (T, N) f32
        e = jnp.where(e > 0, e, NEG_SLOPE * e)                    # LeakyReLU(0.2)
        e = jnp.where(mask, e, MASK_VAL)                          # masked logits
        # masked row-max stabilizer (robust); non-edges underflow to exactly 0
        p = jnp.exp(e - jnp.max(e, axis=-1, keepdims=True))
        denom = jnp.sum(p, axis=-1, keepdims=True)                # (T, 1), >= 1 (self-loops)
        oh = jnp.dot(p.astype(jnp.bfloat16), xh_ref[hd],
                     preferred_element_type=jnp.float32)          # (T, F) f32 acc
        acc = acc + oh * pl.reciprocal(denom, approx=True)
    out = acc + b_ref[...]                                        # 1/heads folded into xh
    if relu:
        out = jnp.maximum(out, 0.0)
    out_ref[...] = out


# --------------------------------------------------------------------------
# tiling / preprocessing helpers
# --------------------------------------------------------------------------
def _vmem_budget_bytes():
    cap = 128 << 20
    try:
        info = pltpu.get_tpu_info()
        cap = getattr(info, "vmem_capacity_bytes", cap) or cap
    except Exception:
        pass
    # ~96 MiB on v5e/v6e (128 MiB physical), ~48 MiB on v7x (64 MiB physical)
    return int(min(cap * 3 // 4, 100 << 20))


def _pick_tile(n, resident_bytes, vmem_budget):
    """Largest power-of-two-ish row tile (multiple of 32) fitting VMEM."""
    # subtract the N-scaling residents (xh, a_src, a_dst, hw, dinv), counted
    # double-buffered (conservative), from the budget before sizing the tile
    budget = max(vmem_budget - 2 * resident_bytes, 2 << 20)
    # per adj row live in the GAT body: int8 stream x2 buffers + bool mask
    # + ~3 f32 (tile, N)-sized temporaries (e, p, exp temp)
    per_row = n * (2 * 1 + 1 + 3 * 4)
    cap = budget // per_row
    # >= 2 row tiles so the "parallel" axis actually feeds both v7x TCs
    limit = min(cap, 1024, max(n // 2, 32))
    tile = 32
    while tile * 2 <= limit:
        tile *= 2
    return tile


def preprocess_graph(adj, *, heads, feat_dim, tile=None):
    """One-time per-graph preprocessing (hoisted off the per-forward path):
    D^{-1/2}, int8 repack of the (self-loop-augmented) adjacency, row padding."""
    n = adj.shape[0]
    vmem_budget = _vmem_budget_bytes()
    resident_bytes = n * (heads * feat_dim * 2      # xh bf16
                          + heads * 4 * 2           # a_src + a_dst f32
                          + feat_dim * 2            # hw bf16
                          + 8)                      # dinv + slack
    if tile is None:
        tile = _pick_tile(n, resident_bytes, vmem_budget)
    assert tile % 32 == 0, "int8 adjacency stream needs a tile multiple of 32"
    n_pad = ((n + tile - 1) // tile) * tile

    adj = adj.astype(jnp.float32)
    deg = jnp.sum(adj, axis=-1, keepdims=True)                # self-loops => deg >= 1
    dinv = jax.lax.rsqrt(jnp.maximum(deg, 1.0))               # (N, 1)

    adj_i8 = jnp.zeros((n_pad, n_pad), jnp.int8).at[:n, :n].set(
        (adj > 0).astype(jnp.int8))
    if n_pad > n:
        pad = jnp.arange(n, n_pad)
        adj_i8 = adj_i8.at[pad, pad].set(1)                   # self-loops keep padded rows finite
        dinv = jnp.concatenate([dinv, jnp.ones((n_pad - n, 1), jnp.float32)], axis=0)

    return dict(adj_i8=adj_i8, dinv=dinv, n=n, n_pad=n_pad, tile=tile,
                vmem_limit=vmem_budget)


# --------------------------------------------------------------------------
# pallas_call wrapper
# --------------------------------------------------------------------------
def _row_map(ndim):
    return lambda i: (i,) + (0,) * (ndim - 1)


def _const_map(ndim):
    return lambda i: (0,) * ndim


def _row_call(kernel, n_pad, tile, f_out, adj_i8, tiled, invariant, cparams):
    in_specs = [pl.BlockSpec((tile, n_pad), _row_map(2))]                 # adj stream
    for a in tiled:                                                       # per-tile blocks
        in_specs.append(pl.BlockSpec((tile,) + a.shape[1:], _row_map(a.ndim)))
    for a in invariant:                                                   # grid-invariant residents
        in_specs.append(pl.BlockSpec(a.shape, _const_map(a.ndim)))
    return pl.pallas_call(
        kernel,
        grid=(n_pad // tile,),
        in_specs=in_specs,
        out_specs=pl.BlockSpec((tile, f_out), _row_map(2)),
        out_shape=jax.ShapeDtypeStruct((n_pad, f_out), jnp.float32),
        compiler_params=cparams,
    )(adj_i8, *tiled, *invariant)


def hybrid_gat_gcn(x, graph, params, *, heads):
    n, n_pad, tile = graph["n"], graph["n_pad"], graph["tile"]
    adj_i8, dinv = graph["adj_i8"], graph["dinv"]
    if n_pad > n:
        x = jnp.pad(x, ((0, n_pad - n), (0, 0)))

    cparams = pltpu.CompilerParams(
        dimension_semantics=("parallel",),          # row tiles shard across v7x's 2 TCs
        vmem_limit_bytes=graph["vmem_limit"],
    )

    def gcn_bn_relu(h, w, b, g, beta, m, v):
        # grid-invariant projection hoisted; column scale folded; BN folded
        hw = ((h @ w) * dinv).astype(jnp.bfloat16)                  # (Np, F)
        scale = g * jax.lax.rsqrt(v + BN_EPS)                       # (1, F)
        shift = (b - m) * scale + beta                              # (1, F)
        return _row_call(_gcn_bn_relu_kernel, n_pad, tile, w.shape[-1], adj_i8,
                         (dinv,), (hw, scale, shift), cparams)

    def gat(h, prefix, relu):
        w = params[f"{prefix}_w"]                                   # (H, Fin, Fout)
        s = params[f"{prefix}_s"][:, 0, :]                          # (H, Fout)
        d = params[f"{prefix}_d"][:, 0, :]                          # (H, Fout)
        fout = w.shape[-1]
        xh = jnp.einsum("nf,hfo->hno", h, w)                        # (H, Np, Fout) f32, hoisted
        a_src = jnp.einsum("hno,ho->hn", xh, s)                     # (H, Np)
        a_dst = jnp.einsum("hno,ho->nh", xh, d)                     # (Np, H)
        xh_b = (xh * (1.0 / heads)).astype(jnp.bfloat16)            # mean-over-heads folded in
        kern = functools.partial(_gat_kernel, heads=heads, relu=relu)
        return _row_call(kern, n_pad, tile, fout, adj_i8,
                         (a_dst,), (xh_b, a_src, params[f"{prefix}_bias"]), cparams)

    h = gcn_bn_relu(x, params["gcn1_w"], params["gcn1_b"],
                    params["bn1_g"], params["bn1_b"], params["bn1_m"], params["bn1_v"])
    # F.dropout(training=False) -> identity
    h = gat(h, "gat1", relu=True)
    h = gcn_bn_relu(h, params["gcn2_w"], params["gcn2_b"],
                    params["bn2_g"], params["bn2_b"], params["bn2_m"], params["bn2_v"])
    out = gat(h, "gat2", relu=False)
    return out[:n]


# --------------------------------------------------------------------------
# plain-JAX reference (inference-mode forward pass, full f32)
# --------------------------------------------------------------------------
def reference(x, adj, p, *, heads):
    deg = adj.sum(-1, keepdims=True)
    dinv = 1.0 / jnp.sqrt(deg)

    def gcn(h, w, b):
        return (adj @ ((h @ w) * dinv)) * dinv + b

    def bn_relu(h, g, beta, m, v):
        return jnp.maximum((h - m) / jnp.sqrt(v + BN_EPS) * g + beta, 0.0)

    def gat(h, w, s, d, b):
        outs = []
        for hd in range(heads):
            xh = h @ w[hd]
            a_dst = xh @ d[hd].reshape(-1, 1)
            a_src = (xh @ s[hd].reshape(-1, 1)).T
            e = a_dst + a_src
            e = jnp.where(e > 0, e, NEG_SLOPE * e)
            logits = jnp.where(adj > 0, e, MASK_VAL)
            attn = jax.nn.softmax(logits, axis=-1)
            outs.append(attn @ xh)
        return sum(outs) / heads + b

    h = bn_relu(gcn(x, p["gcn1_w"], p["gcn1_b"]),
                p["bn1_g"], p["bn1_b"], p["bn1_m"], p["bn1_v"])
    h = jnp.maximum(gat(h, p["gat1_w"], p["gat1_s"], p["gat1_d"], p["gat1_bias"]), 0.0)
    h = bn_relu(gcn(h, p["gcn2_w"], p["gcn2_b"]),
                p["bn2_g"], p["bn2_b"], p["bn2_m"], p["bn2_v"])
    return gat(h, p["gat2_w"], p["gat2_s"], p["gat2_d"], p["gat2_bias"])


def _glorot(key, shape):
    fan_in, fan_out = shape[-2], shape[-1]
    lim = (6.0 / (fan_in + fan_out)) ** 0.5
    return jax.random.uniform(key, shape, jnp.float32, -lim, lim)


if __name__ == "__main__":
    N, IN_DIM, HID, OUT_DIM, HEADS = 64, 8, 32, 8, 2

    key = jax.random.PRNGKey(0)
    ks = jax.random.split(key, 24)

    # node features
    x = jax.random.normal(ks[0], (N, IN_DIM), jnp.float32)

    # deterministic edge set (ring + random undirected edges) -> dense A + I
    src = jnp.arange(N)
    dst = (src + 1) % N
    A = jnp.zeros((N, N), jnp.float32).at[src, dst].set(1.0)
    A = jnp.maximum(A, jax.random.bernoulli(ks[1], 0.05, (N, N)).astype(jnp.float32))
    A = jnp.maximum(A, A.T)                                  # undirected
    adj = jnp.maximum(A, jnp.eye(N, dtype=jnp.float32))      # add self-loops

    params = {
        # GCNConv(in_dim, hidden)
        "gcn1_w": _glorot(ks[2], (IN_DIM, HID)),
        "gcn1_b": 0.1 * jax.random.normal(ks[3], (1, HID), jnp.float32),
        # BatchNorm1d(hidden) -- running stats (inference)
        "bn1_g": 1.0 + 0.1 * jax.random.normal(ks[4], (1, HID), jnp.float32),
        "bn1_b": 0.1 * jax.random.normal(ks[5], (1, HID), jnp.float32),
        "bn1_m": 0.1 * jax.random.normal(ks[6], (1, HID), jnp.float32),
        "bn1_v": 1.0 + 0.1 * jax.random.uniform(ks[7], (1, HID), jnp.float32),
        # GATConv(hidden, hidden, heads=2, concat=False)
        "gat1_w": _glorot(ks[8], (HEADS, HID, HID)),
        "gat1_s": _glorot(ks[9], (HEADS, 1, HID)),
        "gat1_d": _glorot(ks[10], (HEADS, 1, HID)),
        "gat1_bias": 0.1 * jax.random.normal(ks[11], (1, HID), jnp.float32),
        # GCNConv(hidden, hidden)
        "gcn2_w": _glorot(ks[12], (HID, HID)),
        "gcn2_b": 0.1 * jax.random.normal(ks[13], (1, HID), jnp.float32),
        # BatchNorm1d(hidden)
        "bn2_g": 1.0 + 0.1 * jax.random.normal(ks[14], (1, HID), jnp.float32),
        "bn2_b": 0.1 * jax.random.normal(ks[15], (1, HID), jnp.float32),
        "bn2_m": 0.1 * jax.random.normal(ks[16], (1, HID), jnp.float32),
        "bn2_v": 1.0 + 0.1 * jax.random.uniform(ks[17], (1, HID), jnp.float32),
        # GATConv(hidden, out_dim, heads=2, concat=False)
        "gat2_w": _glorot(ks[18], (HEADS, HID, OUT_DIM)),
        "gat2_s": _glorot(ks[19], (HEADS, 1, OUT_DIM)),
        "gat2_d": _glorot(ks[20], (HEADS, 1, OUT_DIM)),
        "gat2_bias": 0.1 * jax.random.normal(ks[21], (1, OUT_DIM), jnp.float32),
    }

    # one-time graph preprocessing (hoisted off the forward path)
    graph = preprocess_graph(adj, heads=HEADS, feat_dim=max(HID, OUT_DIM))

    out = hybrid_gat_gcn(x, graph, params, heads=HEADS)
    out = jax.block_until_ready(out)

    ref = jax.block_until_ready(reference(x, adj, params, heads=HEADS))
    assert out.shape == (N, OUT_DIM)
    # relaxed tolerance vs. an exact-f32 path: bf16 value projections / bf16 MXU
    # matmuls + EUP approximate reciprocal in the deferred softmax normalization.
    err = float(jnp.max(jnp.abs(out - ref)))
    assert jnp.allclose(out, ref, rtol=5e-2, atol=2e-2), err

    print("KERNEL_OK")
</pallas_src>

<mosaic_0001>
module attributes {stable_mosaic.version = 11 : i64} {
  func.func @_gcn_bn_relu_kernel(%arg0: i32, %arg1: memref<32x64xi8, #tpu.memory_space<vmem>>, %arg2: memref<32x1xf32, #tpu.memory_space<vmem>>, %arg3: memref<64x32xbf16, #tpu.memory_space<vmem>>, %arg4: memref<1x32xf32, #tpu.memory_space<vmem>>, %arg5: memref<1x32xf32, #tpu.memory_space<vmem>>, %arg6: memref<32x32xf32, #tpu.memory_space<vmem>>) attributes {dimension_semantics = [#tpu.dimension_semantics<parallel>], iteration_bounds = array<i64: 2>, scalar_prefetch = 0 : i64, scratch_operands = 0 : i64, tpu.core_type = #tpu.core_type<tc>, window_params = [{transform_indices = @transform_0, window_bounds = array<i64: 32, 64>}, {transform_indices = @transform_1, window_bounds = array<i64: 32, 1>}, {pipeline_mode = #tpu.pipeline_mode<synchronous>, transform_indices = @transform_2, window_bounds = array<i64: 64, 32>}, {pipeline_mode = #tpu.pipeline_mode<synchronous>, transform_indices = @transform_3, window_bounds = array<i64: 1, 32>}, {pipeline_mode = #tpu.pipeline_mode<synchronous>, transform_indices = @transform_4, window_bounds = array<i64: 1, 32>}, {transform_indices = @transform_5, window_bounds = array<i64: 32, 32>}]} {
    %c0 = arith.constant 0 : index
    %c0_0 = arith.constant 0 : index
    %0 = vector.load %arg1[%c0, %c0_0] : memref<32x64xi8, #tpu.memory_space<vmem>>, vector<32x64xi8>
    %1 = arith.sitofp %0 : vector<32x64xi8> to vector<32x64xbf16>
    %c0_1 = arith.constant 0 : index
    %c0_2 = arith.constant 0 : index
    %2 = vector.load %arg3[%c0_1, %c0_2] : memref<64x32xbf16, #tpu.memory_space<vmem>>, vector<64x32xbf16>
    %cst = arith.constant dense<0.000000e+00> : vector<32x32xf32>
    %3 = tpu.matmul %1, %2, %cst {dimension_numbers = #tpu.dot_dimension_numbers<[1], [0], [0], [1], [0, 0, 1, 1], [], []>} : vector<32x64xbf16>, vector<64x32xbf16>, vector<32x32xf32> -> vector<32x32xf32>
    %c0_3 = arith.constant 0 : index
    %c0_4 = arith.constant 0 : index
    %4 = vector.load %arg2[%c0_3, %c0_4] : memref<32x1xf32, #tpu.memory_space<vmem>>, vector<32x1xf32>
    %5 = vector.broadcast %4 : vector<32x1xf32> to vector<32x32xf32>
    %6 = arith.mulf %3, %5 : vector<32x32xf32>
    %c0_5 = arith.constant 0 : index
    %c0_6 = arith.constant 0 : index
    %7 = vector.load %arg4[%c0_5, %c0_6] : memref<1x32xf32, #tpu.memory_space<vmem>>, vector<1x32xf32>
    %8 = vector.broadcast %7 : vector<1x32xf32> to vector<32x32xf32>
    %9 = arith.mulf %6, %8 : vector<32x32xf32>
    %c0_7 = arith.constant 0 : index
    %c0_8 = arith.constant 0 : index
    %10 = vector.load %arg5[%c0_7, %c0_8] : memref<1x32xf32, #tpu.memory_space<vmem>>, vector<1x32xf32>
    %11 = vector.broadcast %10 : vector<1x32xf32> to vector<32x32xf32>
    %12 = arith.addf %9, %11 : vector<32x32xf32>
    %cst_9 = arith.constant 0.000000e+00 : f32
    %13 = vector.broadcast %cst_9 : f32 to vector<32x32xf32>
    %14 = arith.maximumf %12, %13 : vector<32x32xf32>
    %c0_10 = arith.constant 0 : index
    %c0_11 = arith.constant 0 : index
    %15 = vector.load %arg6[%c0_10, %c0_11] : memref<32x32xf32, #tpu.memory_space<vmem>>, vector<32x32xf32>
    tpu.vector_store %arg6[%c0_10, %c0_11], %14 {strides = array<i32>} : memref<32x32xf32, #tpu.memory_space<vmem>>, vector<32x32xf32>,
    return
  }
  func.func @transform_0(%arg0: i32) -> (i32, i32) {
    %c0_i32 = arith.constant 0 : i32
    %c0_i32_0 = arith.constant 0 : i32
    return %arg0, %c0_i32 : i32, i32
  }
  func.func @transform_1(%arg0: i32) -> (i32, i32) {
    %c0_i32 = arith.constant 0 : i32
    %c0_i32_0 = arith.constant 0 : i32
    return %arg0, %c0_i32 : i32, i32
  }
  func.func @transform_2(%arg0: i32) -> (i32, i32) {
    %c0_i32 = arith.constant 0 : i32
    %c0_i32_0 = arith.constant 0 : i32
    %c0_i32_1 = arith.constant 0 : i32
    return %c0_i32, %c0_i32_0 : i32, i32
  }
  func.func @transform_3(%arg0: i32) -> (i32, i32) {
    %c0_i32 = arith.constant 0 : i32
    %c0_i32_0 = arith.constant 0 : i32
    %c0_i32_1 = arith.constant 0 : i32
    return %c0_i32, %c0_i32_0 : i32, i32
  }
  func.func @transform_4(%arg0: i32) -> (i32, i32) {
    %c0_i32 = arith.constant 0 : i32
    %c0_i32_0 = arith.constant 0 : i32
    %c0_i32_1 = arith.constant 0 : i32
    return %c0_i32, %c0_i32_0 : i32, i32
  }
  func.func @transform_5(%arg0: i32) -> (i32, i32) {
    %c0_i32 = arith.constant 0 : i32
    %c0_i32_0 = arith.constant 0 : i32
    return %arg0, %c0_i32 : i32, i32
  }
}

</mosaic_0001>

<bundles_post_ra>
// kernel: tpu_custom_call.1
= control target key start
LH: loop header
LB: loop body
LE: loop exit
PB: predicated region body
PF: predicated region fallthrough
CT: control target
= control target key end

     0   :  { %s556_s18 = smov 0   ;;  %s603_s0 = inlined_call_operand.vmem [shape: s8[64,64], index: 0, kind: input, shape index: {}]   ;;  %s604_s1 = inlined_call_operand.vmem [shape: f32[64,1], index: 1, kind: input, shape index: {}]   ;;  %s605_s2 = inlined_call_operand.vmem [shape: bf16[64,32], index: 2, kind: input, shape index: {}]   ;;  %s606_s3 = inlined_call_operand.vmem [shape: f32[1,32], index: 3, kind: input, shape index: {}]   ;;  %s607_s4 = inlined_call_operand.vmem [shape: f32[1,32], index: 4, kind: input, shape index: {}]   ;;  %s608_s5 = inlined_call_operand.vmem [shape: f32[64,32], index: 5, kind: output, shape index: {}]  }
   0x1 LB: > { %s464_s19 = sadd.s32 4294967295, %s523_s18   ;;  %p468_p0 = scmp.ge.s32.totalorder %s523_s18, 1  ;;  %s523_s18 = sphi %s556_s18, %s15_s18  }
   0x2   : > { %p197_p1 = scmp.lt.s32.totalorder %s523_s18, 3 }
   0x4   : > { %p198_p2 = pnand %p468_p0, %p197_p1 }
   0x5   : > { %p229_p3 = scmp.lt.s32.totalorder (!%p198_p2), %s464_s19, 1  ;;  %s470_s28 = sshll.u32 (!%p198_p2), %s464_s19, 2 }
   0x6   : > { %201 = sbr.rel (%p198_p2) target bundleno = 236 (0xec), region = 40  ;;  %p234_p4 = scmp.lt.s32.totalorder (!%p198_p2), %s470_s28, 7 }
   0xb   : > { %v513_v0 = vld [vmem:[%s605_s2 + $0x18] sm:$0xff]   ;;  %v514_v1 = vld [vmem:[%s605_s2 + $0x10] sm:$0xff]   ;;  %s230_s24 = scalar_select %p229_p3, %s464_s19, 1  ;;  %v515_v2 = vld [vmem:[%s605_s2 + $0x8] sm:$0xff]   ;;  %v525_v3 = vmov 0   ;;  %vm281_vm0 = vcmask 523264  }
   0xc   : > { %490 = vmatprep.subr.bf16.mxu0 %v513_v0  ;;  %511 = vset.pattern.permute.xlu0 %v525_v3  ;;  %s610_s28 = smov (!%p234_p4, %s470_s28), 7  ;;  %v516_v6 = vld [vmem:[%s605_s2] sm:$0xff]   ;;  %vm391_vm1 = vcmask 261120  }
   0xd   : > { %491 = vmatpush3.bf16.msra.mxu0 %v513_v0  ;;  %s469_s27 = sshll.u32 %s230_s24, 3  ;;  %512 = vset.pattern.permute.xlu1 %v525_v3  ;;  %s471_s9 = sshll.u32 %s610_s28, 3  ;;  %v480_v18 = vld [vmem:[%s606_s3] ss:$0 sm:$0xff] }
   0xe   : > { %492 = vmatprep.subr.bf16.mxu0 %v514_v1  ;;  %s232_s6 = scalar_lea.vmem %s603_s0, %s469_s27  ;;  %s237_s12 = scalar_lea.vmem %s604_s1, %s471_s9  ;;  %v481_v24 = vld [vmem:[%s607_s4] ss:$0 sm:$0xff] }
   0xf   : > { %v246_v4 = vld [vmem:[%s232_s6] sm:$0xff]  ;;  %v339_v8 = vld [vmem:[%s237_s12 + $0x10] sm:$0xff]  ;;  %v338_v9 = vld [vmem:[%s237_s12 + $0x8] sm:$0xff]  ;;  %s243_s20 = scalar_lea.vmem %s608_s5, %s471_s9 }
  0x10   : > { %v247_v5 = vunpack.c.l.s8.bf16 %v246_v4  ;;  %v337_v7 = vld [vmem:[%s237_s12] sm:$0xff]  ;;  %353 = vperm.xlu1 %512, %v339_v8   ;;  %v248_v10 = vunpack.c.h.s8.bf16 %v246_v4  ;;  %v340_v11 = vld [vmem:[%s237_s12 + $0x18] sm:$0xff] }
  0x11   : > { %493 = vmatpush3.bf16.msra.mxu0 %v514_v1  ;;  %343 = vperm.xlu0 %511, %v337_v7  }
  0x12   : > { %494 = vmatprep.subr.bf16.mxu0 %v515_v2  ;;  %498 = vmatprep.mubr.msk.bf16.mxu0 %vm281_vm0, %v247_v5 }
  0x14   : > { %358 = vperm.xlu1 %512, %v340_v11  }
  0x15   : > { %495 = vmatpush3.bf16.msra.mxu0 %v515_v2  ;;  %348 = vperm.xlu0 %511, %v338_v9  }
  0x16   : > { %496 = vmatprep.subr.bf16.mxu0 %v516_v6 }
  0x19   : > { %497 = vmatpush3.bf16.msra.mxu0 %v516_v6 }
  0x1c   : > { %499 = vmatmul.mubr.msk.bf16.vlgmr.msra.gmra.mxu0 %vm281_vm0, %v248_v10 }
  0x8b   : > { %v354_v12 = vpop.permute.xlu1 %353 }
  0x8c   : > { %v344_v13 = vpop.permute.xlu0 %343 }
  0x8f   : > { %v359_v17 = vpop.permute.xlu1 %358 }
  0x90   : > { %v349_v25 = vpop.permute.xlu0 %348 }
  0xdc   : > { %v500_v14 = vpop.f32.mrf.mxu0 }
  0xdd   : > { %v363_v15 = vmul.f32 %v500_v14, %v354_v12 }
  0xde   : > { %v322_v16 = vpop.f32.mrf.mxu0 }
  0xdf   : > { %v361_v19 = vmul.f32 %v344_v13, %v322_v16  ;;  %v374_v23 = vmul.f32 %v480_v18, %v363_v15 }
  0xe0   : > { %v501_v20 = vpop.f32.mrf.mxu0 }
  0xe1   : > { %v372_v21 = vmul.f32 %v480_v18, %v361_v19  ;;  %v364_v22 = vmul.f32 %v501_v20, %v359_v17  ;;  %v385_v32 = vadd.f32 %v481_v24, %v374_v23 }
  0xe2   : > { %v325_v26 = vpop.f32.mrf.mxu0 }
  0xe3   : > { %v383_v27 = vadd.f32 %v481_v24, %v372_v21  ;;  %v375_v28 = vmul.f32 %v480_v18, %v364_v22  ;;  %v362_v29 = vmul.f32 %v349_v25, %v325_v26  ;;  %v389_v36 = vmax.f32 %v385_v32, 0.0 }
  0xe5   : > { %v387_v30 = vmax.f32 %v383_v27, 0.0  ;;  %v373_v31 = vmul.f32 %v480_v18, %v362_v29  ;;  %v386_v33 = vadd.f32 %v481_v24, %v375_v28  ;;  %394 = vst.msk [vmem:[%s243_s20 + $0x10] sm:$0xff] %vm391_vm1, %v389_v36 }
  0xe7   : > { %392 = vst.msk [vmem:[%s243_s20] sm:$0xff] %vm391_vm1, %v387_v30  ;;  %v384_v34 = vadd.f32 %v481_v24, %v373_v31  ;;  %v390_v37 = vmax.f32 %v386_v33, 0.0 }
  0xe9   : > { %v388_v35 = vmax.f32 %v384_v34, 0.0  ;;  %395 = vst.msk [vmem:[%s243_s20 + $0x18] sm:$0xff] %vm391_vm1, %v390_v37 }
  0xeb   : > { %393 = vst.msk [vmem:[%s243_s20 + $0x8] sm:$0xff] %vm391_vm1, %v388_v35 }
  0xec PF: > { %s15_s18 = sadd.s32 1, %s523_s18  }
  0xed   : > { %p12_p5 = scmp.ge.s32.totalorder %s15_s18, 4  }
  0xef   :  { %14 = sbr.rel (!%p12_p5) target bundleno = 1 (0x1), region = 73 }

</bundles_post_ra>
